<compile_context>
chip_gen: v7x
topology: tpu7x:2x2x1
jax: 0.10.0
libtpu: 0.0.40
codegen_flags: <defaults>
</compile_context>

<pallas_src>
import jax
import jax.numpy as jnp
from jax.experimental import pallas as pl
from jax.experimental.pallas import tpu as pltpu

_LANE = 128


def _vmem_capacity_bytes():
    """Physical VMEM per TensorCore (128 MiB v5e/v6e, 64 MiB v7x)."""
    try:
        info = pltpu.get_tpu_info()
        cap = int(getattr(info, "vmem_capacity_bytes", 0))
        if cap > 0:
            return cap
    except Exception:
        pass
    return 64 << 20  # conservative (v7x-sized) fallback


def _make_mxu_kernel(compute_dtype):
    """Large-channel path: one MXU matmul per (C_out, T) tile."""
    def kernel(x_ref, w_ref, b_ref, o_ref):
        # x_ref: (C_in, T)  w_ref: (C_out, C_in)  b_ref: (C_out, 1)  o_ref: (C_out, T)
        x = x_ref[...].astype(compute_dtype)
        w = w_ref[...].astype(compute_dtype)
        acc = jnp.dot(w, x, preferred_element_type=jnp.float32)
        o_ref[...] = (acc + b_ref[...].astype(jnp.float32)).astype(o_ref.dtype)
    return kernel


def _make_vpu_kernel(c_in, n_acc=4):
    """Tiny-channel path: C_in broadcast multiply-adds on the VPU.

    Uses several independent partial accumulators (no f32 FMA on the VPU, so a
    single chain would be latency-bound) and hoists the input cast out of the
    unrolled channel loop.  Only used for c_in < the MXU cutoff, so the static
    unroll stays short.
    """
    n_acc = max(1, min(n_acc, c_in))

    def kernel(x_ref, w_ref, b_ref, o_ref):
        # x_ref: (C_in, T)  w_ref: (C_out, C_in)  b_ref: (C_out, 1)  o_ref: (C_out, T)
        x = x_ref[...].astype(jnp.float32)          # hoisted cast
        w = w_ref[...].astype(jnp.float32)
        partial = [None] * n_acc                    # independent dep chains
        for c in range(c_in):                       # short static unroll
            term = w[:, c:c + 1] * x[c:c + 1, :]
            s = c % n_acc
            partial[s] = term if partial[s] is None else partial[s] + term
        acc = jnp.broadcast_to(b_ref[...].astype(jnp.float32), o_ref.shape)
        for p in partial:
            if p is not None:
                acc = acc + p
        o_ref[...] = acc.astype(o_ref.dtype)
    return kernel


def _pick_lane_tile(HW, C_in, C_out, itemsize, budget_bytes, n_batch,
                    min_total_steps=4, min_tile_bytes=1 << 20):
    """Pick the H*W lane-tile size T (multiple of 128 unless HW is tiny)."""
    # One buffer each of an x column and an out column.
    per_col = (C_in + C_out) * itemsize
    # Weight + bias blocks are double-buffered by the pipeline even though
    # their index_map is constant; budget them up front.
    resident = 2 * (C_out * C_in + C_out) * itemsize
    avail = budget_bytes - resident
    max_blocks = max(int(avail // (2 * per_col * _LANE)), 1)

    if HW <= _LANE:
        return HW  # tiny spatial extent: a single (possibly masked) tile

    hw_blocks = -(-HW // _LANE)

    # (a) Encourage >= min_total_steps grid steps overall (pipeline overlap,
    #     and both v7x TensorCores get work even when n_batch is small).
    want_hw_tiles = max(1, -(-min_total_steps // max(n_batch, 1)))
    split_blocks = max(1, hw_blocks // want_hw_tiles)
    # (b) ... but keep each x tile >= ~min_tile_bytes so the ~0.35 us/step
    #     overhead stays small (unless the whole axis is smaller than that).
    floor_blocks = max(1, min_tile_bytes // (C_in * itemsize * _LANE))

    blocks = min(max_blocks, hw_blocks, split_blocks)
    blocks = max(blocks, min(floor_blocks, max_blocks, hw_blocks))

    # (c) Prefer a tile that divides H*W evenly -> every output store is a
    #     full-lane unmasked vst; only snap down if it costs < 2x tile size.
    if HW % _LANE == 0 and hw_blocks % blocks != 0:
        d = blocks
        while d > 1 and hw_blocks % d != 0:
            d -= 1
        if d * 2 >= blocks:
            blocks = d
    return blocks * _LANE


def conv1x1(x_nchw, weight, bias, *, lane_tile=None, vmem_budget_bytes=None,
            mxu_cutoff=32, mxu_bf16="auto"):
    """1x1 conv, stride 1, in native NCHW layout.

    x_nchw: (N, C_in, H, W)
    weight: (C_out, C_in)   (the 1x1 kernel squeezed)
    bias:   (C_out,)
    returns (N, C_out, H, W)
    """
    N, C_in, H, W = x_nchw.shape
    C_out, C_in_w = weight.shape
    assert C_in_w == C_in
    HW = H * W
    itemsize = jnp.dtype(x_nchw.dtype).itemsize

    vmem_cap = _vmem_capacity_bytes()
    if vmem_budget_bytes is None:
        # ~70% of physical VMEM: ~89 MiB on v5e/v6e, ~44 MiB on v7x.
        vmem_budget_bytes = int(vmem_cap * 0.70)
    vmem_budget_bytes = min(vmem_budget_bytes, vmem_cap - (4 << 20))

    x3 = x_nchw.reshape(N, C_in, HW)     # NCHW is already (N, C, H*W) contiguous
    b2 = bias.reshape(C_out, 1)          # broadcasts over the lane axis

    if lane_tile is not None:
        T = min(lane_tile, HW)
    else:
        T = _pick_lane_tile(HW, C_in, C_out, itemsize, vmem_budget_bytes, N)
    n_hw = pl.cdiv(HW, T)

    use_mxu = min(C_in, C_out) >= mxu_cutoff
    if use_mxu:
        if mxu_bf16 == "auto":
            # bf16 MXU operands when the inputs are already bf16, or when the
            # channel count is large enough that the f32 path would be
            # MXU-bound (v6e/v7x MXU is native bf16; keep f32 otherwise so
            # small/medium-C f32 convs stay exact and HBM-bound anyway).
            cast_bf16 = (x_nchw.dtype == jnp.bfloat16
                         or weight.dtype == jnp.bfloat16
                         or min(C_in, C_out) >= 512)
        else:
            cast_bf16 = bool(mxu_bf16)
        compute_dtype = jnp.bfloat16 if cast_bf16 else jnp.float32
        kernel = _make_mxu_kernel(compute_dtype)
    else:
        kernel = _make_vpu_kernel(C_in)

    # Explicit scoped-VMEM limit: actual footprint (double-buffered x/out
    # tiles + double-buffered weight/bias) plus headroom for compiler scratch,
    # clamped to physical capacity.  Avoids the 16/32 MiB default-limit trap.
    resident = 2 * (C_out * C_in + C_out) * itemsize
    tile_bytes = 2 * (C_in + C_out) * itemsize * T
    vmem_limit = int(min(vmem_cap,
                         max(vmem_budget_bytes, resident + tile_bytes) + (8 << 20)))

    out3 = pl.pallas_call(
        kernel,
        out_shape=jax.ShapeDtypeStruct((N, C_out, HW), x_nchw.dtype),
        grid_spec=pltpu.PrefetchScalarGridSpec(
            num_scalar_prefetch=0,
            grid=(N, n_hw),
            in_specs=[
                # x tile: batch dim squeezed, lane-dense H*W tile last.
                pl.BlockSpec((None, C_in, T), lambda n, j: (n, 0, j)),
                # full weight, resident across the grid
                pl.BlockSpec((C_out, C_in), lambda n, j: (0, 0)),
                # bias column, resident across the grid
                pl.BlockSpec((C_out, 1), lambda n, j: (0, 0)),
            ],
            out_specs=pl.BlockSpec((None, C_out, T), lambda n, j: (n, 0, j)),
        ),
        compiler_params=pltpu.CompilerParams(
            dimension_semantics=("parallel", "parallel"),
            vmem_limit_bytes=vmem_limit),
    )(x3, weight, b2)

    return out3.reshape(N, C_out, H, W)


if __name__ == "__main__":
    key = jax.random.PRNGKey(0)

    # --- Case 1: the module's shape regime (tiny channels -> VPU path) ------
    k_x, k_w, k_b, k2_x, k2_w, k2_b = jax.random.split(key, 6)
    N, C, H, W = 2, 4, 16, 16
    x = jax.random.normal(k_x, (N, C, H, W), dtype=jnp.float32)
    bound = 1.0 / jnp.sqrt(jnp.float32(C))
    weight = jax.random.uniform(k_w, (C, C), jnp.float32, -bound, bound)
    bias = jax.random.uniform(k_b, (C,), jnp.float32, -bound, bound)

    out = conv1x1(x, weight, bias)
    out = jax.block_until_ready(out)
    ref = jnp.einsum("nchw,oc->nohw", x, weight) + bias[None, :, None, None]
    assert out.shape == (N, C, H, W)
    assert jnp.allclose(out, ref, atol=1e-5, rtol=1e-5)

    # --- Case 2: exercise the MXU path (channels >= cutoff) -----------------
    N2, C2, H2, W2 = 2, 64, 16, 16
    x2 = jax.random.normal(k2_x, (N2, C2, H2, W2), dtype=jnp.float32)
    bound2 = 1.0 / jnp.sqrt(jnp.float32(C2))
    weight2 = jax.random.uniform(k2_w, (C2, C2), jnp.float32, -bound2, bound2)
    bias2 = jax.random.uniform(k2_b, (C2,), jnp.float32, -bound2, bound2)

    out2 = conv1x1(x2, weight2, bias2)
    out2 = jax.block_until_ready(out2)
    ref2 = jnp.einsum("nchw,oc->nohw", x2, weight2) + bias2[None, :, None, None]
    assert out2.shape == (N2, C2, H2, W2)
    # Loose tolerance: both paths may use TPU default (reduced) f32 matmul precision.
    assert jnp.allclose(out2, ref2, atol=2e-2, rtol=2e-2)

    print("KERNEL_OK")
</pallas_src>

<mosaic_0001>
module attributes {stable_mosaic.version = 11 : i64} {
  func.func @kernel(%arg0: i32, %arg1: i32, %arg2: memref<1x4x256xf32, #tpu.memory_space<vmem>>, %arg3: memref<4x4xf32, #tpu.memory_space<vmem>>, %arg4: memref<4x1xf32, #tpu.memory_space<vmem>>, %arg5: memref<1x4x256xf32, #tpu.memory_space<vmem>>) attributes {dimension_semantics = [#tpu.dimension_semantics<parallel>, #tpu.dimension_semantics<parallel>], iteration_bounds = array<i64: 2, 1>, scalar_prefetch = 0 : i64, scratch_operands = 0 : i64, tpu.core_type = #tpu.core_type<tc>, window_params = [{transform_indices = @transform_0, window_bounds = array<i64: 1, 4, 256>}, {pipeline_mode = #tpu.pipeline_mode<synchronous>, transform_indices = @transform_1, window_bounds = array<i64: 4, 4>}, {pipeline_mode = #tpu.pipeline_mode<synchronous>, transform_indices = @transform_2, window_bounds = array<i64: 4, 1>}, {transform_indices = @transform_3, window_bounds = array<i64: 1, 4, 256>}]} {
    %c0 = arith.constant 0 : index
    %c0_0 = arith.constant 0 : index
    %c0_1 = arith.constant 0 : index
    %0 = vector.load %arg2[%c0, %c0_0, %c0_1] : memref<1x4x256xf32, #tpu.memory_space<vmem>>, vector<1x4x256xf32>
    %1 = vector.shape_cast %0 : vector<1x4x256xf32> to vector<4x256xf32>
    %c0_2 = arith.constant 0 : index
    %c0_3 = arith.constant 0 : index
    %2 = vector.load %arg3[%c0_2, %c0_3] : memref<4x4xf32, #tpu.memory_space<vmem>>, vector<4x4xf32>
    %3 = vector.extract_strided_slice %2 {offsets = [0, 0], sizes = [4, 1], strides = [1, 1]} : vector<4x4xf32> to vector<4x1xf32>
    %4 = vector.extract_strided_slice %1 {offsets = [0, 0], sizes = [1, 256], strides = [1, 1]} : vector<4x256xf32> to vector<1x256xf32>
    %5 = vector.broadcast %3 : vector<4x1xf32> to vector<4x256xf32>
    %6 = vector.broadcast %4 : vector<1x256xf32> to vector<4x256xf32>
    %7 = arith.mulf %5, %6 : vector<4x256xf32>
    %8 = vector.extract_strided_slice %2 {offsets = [0, 1], sizes = [4, 1], strides = [1, 1]} : vector<4x4xf32> to vector<4x1xf32>
    %9 = vector.extract_strided_slice %1 {offsets = [1, 0], sizes = [1, 256], strides = [1, 1]} : vector<4x256xf32> to vector<1x256xf32>
    %10 = vector.broadcast %8 : vector<4x1xf32> to vector<4x256xf32>
    %11 = vector.broadcast %9 : vector<1x256xf32> to vector<4x256xf32>
    %12 = arith.mulf %10, %11 : vector<4x256xf32>
    %13 = vector.extract_strided_slice %2 {offsets = [0, 2], sizes = [4, 1], strides = [1, 1]} : vector<4x4xf32> to vector<4x1xf32>
    %14 = vector.extract_strided_slice %1 {offsets = [2, 0], sizes = [1, 256], strides = [1, 1]} : vector<4x256xf32> to vector<1x256xf32>
    %15 = vector.broadcast %13 : vector<4x1xf32> to vector<4x256xf32>
    %16 = vector.broadcast %14 : vector<1x256xf32> to vector<4x256xf32>
    %17 = arith.mulf %15, %16 : vector<4x256xf32>
    %18 = vector.extract_strided_slice %2 {offsets = [0, 3], sizes = [4, 1], strides = [1, 1]} : vector<4x4xf32> to vector<4x1xf32>
    %19 = vector.extract_strided_slice %1 {offsets = [3, 0], sizes = [1, 256], strides = [1, 1]} : vector<4x256xf32> to vector<1x256xf32>
    %20 = vector.broadcast %18 : vector<4x1xf32> to vector<4x256xf32>
    %21 = vector.broadcast %19 : vector<1x256xf32> to vector<4x256xf32>
    %22 = arith.mulf %20, %21 : vector<4x256xf32>
    %c0_4 = arith.constant 0 : index
    %c0_5 = arith.constant 0 : index
    %23 = vector.load %arg4[%c0_4, %c0_5] : memref<4x1xf32, #tpu.memory_space<vmem>>, vector<4x1xf32>
    %24 = vector.shape_cast %23 : vector<4x1xf32> to vector<4x1xf32>
    %25 = vector.broadcast %24 : vector<4x1xf32> to vector<4x256xf32>
    %26 = arith.addf %25, %7 : vector<4x256xf32>
    %27 = arith.addf %26, %12 : vector<4x256xf32>
    %28 = arith.addf %27, %17 : vector<4x256xf32>
    %29 = arith.addf %28, %22 : vector<4x256xf32>
    %c0_6 = arith.constant 0 : index
    %c0_7 = arith.constant 0 : index
    %c0_8 = arith.constant 0 : index
    %30 = vector.load %arg5[%c0_6, %c0_7, %c0_8] : memref<1x4x256xf32, #tpu.memory_space<vmem>>, vector<1x4x256xf32>
    %31 = vector.shape_cast %30 : vector<1x4x256xf32> to vector<4x256xf32>
    %32 = vector.shape_cast %29 : vector<4x256xf32> to vector<1x4x256xf32>
    tpu.vector_store %arg5[%c0_6, %c0_7, %c0_8], %32 {strides = array<i32>} : memref<1x4x256xf32, #tpu.memory_space<vmem>>, vector<1x4x256xf32>,
    return
  }
  func.func @transform_0(%arg0: i32, %arg1: i32) -> (i32, i32, i32) {
    %c0_i32 = arith.constant 0 : i32
    %c0_i32_0 = arith.constant 0 : i32
    return %arg0, %c0_i32, %arg1 : i32, i32, i32
  }
  func.func @transform_1(%arg0: i32, %arg1: i32) -> (i32, i32) {
    %c0_i32 = arith.constant 0 : i32
    %c0_i32_0 = arith.constant 0 : i32
    %c0_i32_1 = arith.constant 0 : i32
    return %c0_i32, %c0_i32_0 : i32, i32
  }
  func.func @transform_2(%arg0: i32, %arg1: i32) -> (i32, i32) {
    %c0_i32 = arith.constant 0 : i32
    %c0_i32_0 = arith.constant 0 : i32
    %c0_i32_1 = arith.constant 0 : i32
    return %c0_i32, %c0_i32_0 : i32, i32
  }
  func.func @transform_3(%arg0: i32, %arg1: i32) -> (i32, i32, i32) {
    %c0_i32 = arith.constant 0 : i32
    %c0_i32_0 = arith.constant 0 : i32
    return %arg0, %c0_i32, %arg1 : i32, i32, i32
  }
}

</mosaic_0001>

<bundles_post_ra>
// kernel: tpu_custom_call.1
= control target key start
LH: loop header
LB: loop body
LE: loop exit
PB: predicated region body
PF: predicated region fallthrough
CT: control target
= control target key end

     0   :  { %8 = vsyncpa [#allocation3], 0  ;;  %s838_s0 = inlined_call_operand.hbm [shape: f32[2,4,256], index: 0, kind: input, shape index: {}]   ;;  %s839_s1 = inlined_call_operand.vmem [shape: f32[4,4], index: 1, kind: input, shape index: {}]   ;;  %s840_s2 = inlined_call_operand.vmem [shape: f32[4,1], index: 2, kind: input, shape index: {}]   ;;  %s841_s3 = inlined_call_operand.hbm [shape: f32[2,4,256], index: 3, kind: output, shape index: {}]  }
   0x1   :  { %10 = vsyncpa [#allocation3 + $0x1], 0 }
   0x2   :  { %11 = vsyncpa [#allocation4], 0 }
   0x3   :  { %13 = vsyncpa [#allocation4 + $0x1], 0  ;;  %s656_s12 = smov 0   ;;  %s658_s13 = smov 0  }
   0x4   :  { %s660_s14 = smov 0   ;;  %s662_s15 = smov 0  }
   0x5   :  { %s664_s16 = smov 0   ;;  %s666_s17 = smov 0  }
   0x6 LB: > { %s427_s18 = sadd.s32 4294967295, %s628_s17   ;;  %s428_s19 = sadd.s32 4294967294, %s628_s17   ;;  %s628_s17 = sphi %s666_s17, %s19_s17   ;;  %s624_s16 = sphi %s664_s16, %s857_s16   ;;  %s620_s15 = sphi %s662_s15, %s856_s15   ;;  %s616_s14 = sphi %s660_s14, %s855_s14   ;;  %s612_s13 = sphi %s658_s13, %s854_s13   ;;  %s608_s12 = sphi %s656_s12, %s853_s12  }
   0x7   : > { %s31_s20 = sadd.s32 1, %s624_s16  ;;  %s40_s21 = sadd.s32 1, %s616_s14 }
   0x8   : > { %p33_p0 = scmp.ge.s32.totalorder %s31_s20, 2  ;;  %p47_p1 = scmp.ne.s32.totalorder %s616_s14, %s612_s13 }
   0x9   : > { %p48_p2 = scmp.eq.s32.totalorder %s628_s17, 0  ;;  %p53_p3 = scmp.ne.s32.totalorder %s612_s13, %s608_s12 }
   0xa   : > { %s859_s20 = smov (%p33_p0, %s31_s20), 0  ;;  %p54_p5 = scmp.eq.s32.totalorder %s427_s18, 0 }
   0xb   : > { %p697_p4 = por %p48_p2, %p47_p1  ;;  %s35_s23 = ssub.s32 %s624_s16, %s859_s20 }
   0xc   : > { %p121_p6 = scmp.eq.s32.totalorder %s427_s18, 1  ;;  %p38_p7 = scmp.eq.s32.totalorder %s35_s23, 0 }
   0xd   : > { %p703_p8 = por %p54_p5, %p53_p3  ;;  %p127_p10 = scmp.eq.s32.totalorder %s428_s19, 1 }
   0xe   : > { %p707_p9 = por %p121_p6, %p47_p1  ;;  %p456_p13 = scmp.lt.s32.totalorder %s628_s17, 2 }
   0xf   : > { %s712_s26 = scalar_select %p38_p7, %s616_s14, %s40_s21  }
  0x10   : > { %s845_s25 = scalar_select %p707_p9, 1, 0 }
  0x11   : > { %p714_p11 = por %p127_p10, %p53_p3  ;;  %s153_s28 = sand.u32 1, %s616_s14  }
  0x12   : > { %s431_s29 = sshll.u32 %s153_s28, 3  ;;  %s442_s30 = sshll.u32 %s624_s16, 7 }
  0x13   : > { %s846_s27 = scalar_select %p714_p11, 1, 0 }
  0x14   : > { %s725_s6 = scalar_lea.hbm %s838_s0, %s442_s30  ;;  %s157_s7 = scalar_lea.vmem [#allocation2], %s431_s29 }
  0x15   : > { %s167_s8 = sshll.u32 %s157_s7, 4  ;;  %p731_p0 = pnand %p456_p13, %p697_p4  ;;  %s727_s8 = int_to_ptr.vmem [resolvable:$true] %s167_s8 }
  0x16   : > { %s154_s10 = scalar_lea.sflag [#allocation3], %s153_s28  ;;  %s516_s11 = scalar_lea.hbm %s725_s6, 128 }
  0x17   : > { %p517_p3 = scmp.ne.s32.totalorder %s725_s6, %s516_s11  ;;  %p518_p5 = pneg %p731_p0 }
  0x18   : > { %s521_s21 = scalar_lea.hbm %s838_s0, 256  ;;  %p522_p4 = scmp.lt.u32.totalorder %s725_s6, %s838_s0 }
  0x19   : > { %p519_p6 = pnand %p518_p5, %p517_p3  ;;  %p523_p10 = scmp.lt.u32.totalorder %s521_s21, %s516_s11 }
  0x1a   : > { %p525_p12 = scmp.lt.u32.totalorder %s516_s11, %s725_s6 }
  0x1b   : > { %p520_p7 = pneg %p519_p6  ;;  %p524_p13 = por %p523_p10, %p522_p4 }
  0x1d   : > { %p526_p1 = por %p525_p12, %p524_p13 }
  0x1f   : > { %p527_p2 = pnand %p526_p1, %p520_p7 }
  0x21   : > { %530 = shalt.err (!%p527_p2)
}
  0x22   : > { %s531_s28 = scalar_lea.vmem %s727_s8, 128  ;;  %s630_s29 = smov [#allocation2]  }
  0x23   : > { %p532_p3 = scmp.ne.s32.totalorder %s727_s8, %s531_s28  ;;  %s536_s30 = sshll.u32 %s630_s29, 4  ;;  %s537_s30 = int_to_ptr.vmem [resolvable:$false] %s536_s30 }
  0x24   : > { %s538_s4 = scalar_lea.vmem %s537_s30, 256  ;;  %p539_p9 = scmp.lt.s32.totalorder %s727_s8, %s537_s30 }
  0x25   : > { %p534_p6 = pnand %p532_p3, %p518_p5  ;;  %p540_p4 = scmp.lt.s32.totalorder %s538_s4, %s531_s28 }
  0x27   : > { %p535_p11 = pneg %p534_p6  ;;  %p541_p10 = por %p540_p4, %p539_p9 }
  0x29   : > { %p542_p12 = pnand %p541_p10, %p535_p11 }
  0x2b   : > { %545 = shalt.err (!%p542_p12)
}
  0x2c   : > { %451 = dma.hbm_to_vmem [thread:$0]  (!%p731_p0), %s725_s6, 128, %s727_s8, %s154_s10  }
  0x2d   : > { %p848_p1 = scmp.lt.s32.totalorder %s628_s17, 3  ;;  %p849_p2 = scmp.ge.s32.totalorder %s628_s17, 1 }
  0x2f   : > { %p173_p5 = pnand %p849_p2, %p848_p1 }
  0x30   : > { %s767_s5 = sand.u32 (!%p173_p5), 1, %s612_s13  }
  0x31   : > { %176 = sbr.rel (%p173_p5) target bundleno = 217 (0xd9), region = 32  ;;  %s435_s7 = sshll.u32 (!%p173_p5), %s767_s5, 3 }
  0x32   : > { %s179_s11 = scalar_lea.sflag (!%p173_p5), [#allocation3], %s767_s5  ;;  %s182_s9 = scalar_lea.vmem (!%p173_p5), [#allocation2], %s435_s7 }
  0x38   : > { %599 = dma.done.wait (%p703_p8), %s179_s11, 128  }
  0x39   : > { %601 = vsyncadd (%p703_p8), %s179_s11, 4294967168  ;;  %v631_v0 = vmov 0   ;;  %v307_v1 = vld [vmem:[%s840_s2] sm:$0xf]  ;;  %v632_v3 = vmov 2   ;;  %v633_v4 = vmov 1   ;;  %v215_v6 = vlaneseq }
  0x3a   : > { %512 = vset.pattern.permute.xlu1 %v631_v0  ;;  %510 = vset.pattern.permute.xlu0 %v631_v0  ;;  %v208_v2 = vld [vmem:[%s839_s1] sm:$0xf]  ;;  %v634_v5 = vmov 3   ;;  %s443_s24 = sshll.u32 %s620_s15, 7  ;;  %s204_s19 = scalar_lea.vmem [#allocation5], %s435_s7 }
  0x3b   : > { %310 = vperm.xlu1 %512, %v307_v1   ;;  %211 = vperm.xlu0 %510, %v208_v2   ;;  %v216_v7 = vshrl.u32 %v215_v6, 7  ;;  %v207_v10 = vld [vmem:[%s182_s9] sm:$0xff]  ;;  %s343_s21 = sshll.u32 %s204_s19, 4  ;;  %s789_s28 = scalar_lea.hbm %s841_s3, %s443_s24  ;;  %s791_s21 = int_to_ptr.vmem [resolvable:$true] %s343_s21 }
  0x3c   : > { %s327_s29 = scalar_lea.sflag [#allocation4], %s767_s5  ;;  %s546_s30 = scalar_lea.vmem %s791_s21, 128 }
  0x3d   : > { %v217_v8 = vsub.s32 0, %v216_v7  ;;  %v221_v9 = vsub.s32 4, %v216_v7  ;;  %v241_v13 = vsub.s32 1, %v216_v7  ;;  %v245_v14 = vsub.s32 5, %v216_v7  ;;  %p547_p8 = scmp.ne.s32.totalorder %s791_s21, %s546_s30  ;;  %p850_p9 = scmp.ne.s32.totalorder %s845_s25, 0 }
  0x3e   : > { %v265_v15 = vsub.s32 2, %v216_v7  ;;  %v269_v16 = vsub.s32 6, %v216_v7  ;;  %v289_v21 = vsub.s32 3, %v216_v7  ;;  %v293_v22 = vsub.s32 7, %v216_v7  ;;  %s635_s15 = smov [#allocation5]  }
  0x3f   : > { %513 = vset.pattern.permute.xlu1 %v632_v3  ;;  %511 = vset.pattern.permute.xlu0 %v633_v4  ;;  %v218_v11 = vrot.slane %v207_v10, %v217_v8  ;;  %v222_v12 = vrot.slane %v207_v10, %v221_v9  ;;  %v242_v19 = vrot.slane %v207_v10, %v241_v13  ;;  %p548_p11 = pnand %p547_p8, %p850_p9  ;;  %s550_s4 = sshll.u32 %s635_s15, 4  ;;  %s551_s4 = int_to_ptr.vmem [resolvable:$false] %s550_s4 }
  0x40   : > { %260 = vperm.xlu1 %513, %v208_v2   ;;  %236 = vperm.xlu0 %511, %v208_v2   ;;  %v246_v20 = vrot.slane %v207_v10, %v245_v14  ;;  %v266_v25 = vrot.slane %v207_v10, %v265_v15  ;;  %v270_v26 = vrot.slane %v207_v10, %v269_v16  ;;  %s552_s7 = scalar_lea.vmem %s551_s4, 256  ;;  %p553_p7 = scmp.lt.s32.totalorder %s791_s21, %s551_s4 }
  0x41   : > { %v228_v17 = vrot.slane %v218_v11, %v217_v8  ;;  %v232_v18 = vrot.slane %v222_v12, %v217_v8  ;;  %v252_v29 = vrot.slane %v242_v19, %v241_v13  ;;  %v290_v31 = vrot.slane %v207_v10, %v289_v21  ;;  %p549_p0 = pneg %p548_p11  ;;  %p554_p13 = scmp.lt.s32.totalorder %s552_s7, %s546_s30 }
  0x42   : > { %v256_v30 = vrot.slane %v246_v20, %v241_v13  ;;  %v294_v32 = vrot.slane %v207_v10, %v293_v22  ;;  %v276_v33 = vrot.slane %v266_v25, %v265_v15  ;;  %v280_v34 = vrot.slane %v270_v26, %v265_v15 }
  0x43   : > { %v300_v41 = vrot.slane %v290_v31, %v289_v21  ;;  %p555_p3 = por %p554_p13, %p553_p7 }
  0x44   : > { %514 = vset.pattern.permute.xlu1 %v634_v5  ;;  %515 = vset.pattern.permute.xlu0 %v631_v0  ;;  %v304_v42 = vrot.slane %v294_v32, %v289_v21 }
  0x45   : > { %284 = vperm.xlu1 %514, %v208_v2   ;;  %p556_p6 = pnand %p555_p3, %p549_p0 }
  0xba   : > { %v311_v23 = vpop.permute.xlu1 %310  ;;  %v212_v24 = vpop.permute.xlu0 %211 }
  0xbb   : > { %v233_v27 = vmul.f32 %v228_v17, %v212_v24  ;;  %v234_v28 = vmul.f32 %v232_v18, %v212_v24 }
  0xbd   : > { %v313_v37 = vadd.f32 %v311_v23, %v233_v27  ;;  %v314_v38 = vadd.f32 %v311_v23, %v234_v28 }
  0xbf   : > { %v261_v35 = vpop.permute.xlu1 %260  ;;  %v237_v36 = vpop.permute.xlu0 %236 }
  0xc0   : > { %v257_v39 = vmul.f32 %v252_v29, %v237_v36  ;;  %v258_v40 = vmul.f32 %v256_v30, %v237_v36  ;;  %v281_v43 = vmul.f32 %v276_v33, %v261_v35  ;;  %v282_v44 = vmul.f32 %v280_v34, %v261_v35 }
  0xc2   : > { %v315_v45 = vadd.f32 %v313_v37, %v257_v39  ;;  %v316_v46 = vadd.f32 %v314_v38, %v258_v40 }
  0xc4   : > { %v285_v47 = vpop.permute.xlu1 %284  ;;  %v317_v48 = vadd.f32 %v315_v45, %v281_v43  ;;  %v318_v49 = vadd.f32 %v316_v46, %v282_v44 }
  0xc5   : > { %v305_v50 = vmul.f32 %v300_v41, %v285_v47  ;;  %v306_v51 = vmul.f32 %v304_v42, %v285_v47 }
  0xc7   : > { %v319_v52 = vadd.f32 %v317_v48, %v305_v50  ;;  %v320_v53 = vadd.f32 %v318_v49, %v306_v51 }
  0xc9   : > { %v323_v54 = vcombine.low %v319_v52, %v320_v53 }
  0xcb   : > { %325 = vst [vmem:[%s204_s19] sm:$0xff] %v323_v54 }
  0xcc   : > { %559 = shalt.err (!%p556_p6)
}
  0xcd   : > { %s560_s5 = scalar_lea.hbm %s789_s28, 128  ;;  %s564_s6 = scalar_lea.hbm %s841_s3, 256 }
  0xce   : > { %p561_p4 = scmp.ne.s32.totalorder %s789_s28, %s560_s5  ;;  %p565_p1 = scmp.lt.u32.totalorder %s789_s28, %s841_s3 }
  0xcf   : > { %p566_p2 = scmp.lt.u32.totalorder %s564_s6, %s560_s5  ;;  %p568_p8 = scmp.lt.u32.totalorder %s560_s5, %s789_s28 }
  0xd0   : > { %p562_p10 = pnand %p561_p4, %p850_p9 }
  0xd1   : > { %p567_p5 = por %p566_p2, %p565_p1 }
  0xd2   : > { %p563_p12 = pneg %p562_p10 }
  0xd3   : > { %p569_p11 = por %p568_p8, %p567_p5 }
  0xd5   : > { %p570_p0 = pnand %p569_p11, %p563_p12 }
  0xd7   : > { %573 = shalt.err (!%p570_p0)
}
  0xd8   : > { %446 = dma.vmem_to_hbm [thread:$0]  (%p850_p9), %s791_s21, 128, %s789_s28, %s327_s29  }
  0xd9 PF: > { %s355_s18 = sand.u32 1, %s608_s12   ;;  %p851_p7 = scmp.ne.s32.totalorder %s846_s27, 0 }
  0xda   : > { %p852_p13 = scmp.ge.s32.totalorder %s628_s17, 2  ;;  %s356_s24 = scalar_lea.sflag [#allocation4], %s355_s18 }
  0xdc   : > { %p453_p3 = pnand %p852_p13, %p851_p7 }
  0xde   : > { %603 = dma.done.wait (!%p453_p3), %s356_s24, 128  }
  0xdf   : > { %605 = vsyncadd (!%p453_p3), %s356_s24, 4294967168  ;;  %s19_s17 = sadd.s32 1, %s628_s17   ;;  %s853_s12 = smov %s612_s13 }
  0xe0   : > { %p16_p6 = scmp.ge.s32.totalorder %s19_s17, 4   ;;  %s854_s13 = smov %s616_s14 }
  0xe1   : > { %s855_s14 = smov %s712_s26  ;;  %s856_s15 = smov %s624_s16 }
  0xe2   : > { %s857_s16 = smov %s859_s20  ;;  %18 = sbr.rel (!%p16_p6) target bundleno = 6 (0x6), region = 77 }
  0xe9   :  { %361 = vsyncpa [#allocation3], 1 }
  0xea   :  { %363 = vsyncpa [#allocation3 + $0x1], 1 }
  0xeb   :  { %364 = vsyncpa [#allocation4], 1 }
  0xec   :  { %366 = vsyncpa [#allocation4 + $0x1], 1 }

</bundles_post_ra>
